<compile_context>
chip_gen: v5e
topology: v5e:2x2
jax: 0.10.0
libtpu: 0.0.40
codegen_flags: <defaults>
</compile_context>

<pallas_src>
import numpy as np
import jax
import jax.numpy as jnp
from jax import lax
from jax.experimental import pallas as pl
from jax.experimental.pallas import tpu as pltpu


# ----------------------------------------------------------------------------
# Fused sampler kernel.
#   grid = (n_hw_tiles, n_t_chunks)
#     h = program_id(0): "parallel" hw-tile axis (feeds both TCs on v7x)
#     c = program_id(1): "arbitrary" chunk axis; out_ref is VMEM-resident
#                        across it and carries the evolving x.
#
#   coef_ref  (SMEM, (2, T) f32): [a_t ; b_t] per reverse step (long axis last)
#   dcol_ref  (VMEM, (T_CHUNK, BC, 1) f32): d_t = -b_t * bias_t (folded on host)
#   wbd_ref   (VMEM, (BC, BC) f32): block-diagonal channel-mixing weight
#   x_init_ref(VMEM, (BC, hw_tile) f32): x_T tile
#   noise_ref (VMEM, (T_CHUNK, BC, hw_tile) f32): sigma_t * N(0,1), zero at t=0
#   out_ref   (VMEM, (BC, hw_tile) f32): evolving state / final x_0
#
#   Per-step update (all scalar algebra folded on the host):
#       x <- a_t * x - b_t * (W_bd @ x) + d_t + noise'_t
# ----------------------------------------------------------------------------
def _sampler_kernel(coef_ref, dcol_ref, wbd_ref, x_init_ref, noise_ref, out_ref):
    c = pl.program_id(1)
    n_chunks = pl.num_programs(1)
    t_chunk = noise_ref.shape[0]

    # First chunk: load x_T into the resident state.
    @pl.when(c == 0)
    def _():
        out_ref[...] = x_init_ref[...]

    w_bd = wbd_ref[...]                 # (BC, BC)
    x0 = out_ref[...]                   # (BC, hw_tile), f32

    def step(i, x):
        t = c * t_chunk + i             # global reverse-step index
        a = coef_ref[0, t]              # scalar from SMEM
        b = coef_ref[1, t]              # scalar from SMEM
        d = dcol_ref[i]                 # (BC, 1)   = -b_t * bias_t
        nz = noise_ref[i]               # (BC, hw_tile) = sigma_t * N(0,1)
        eps = jnp.dot(w_bd, x, preferred_element_type=jnp.float32)
        return a * x - b * eps + d + nz

    x_fin = lax.fori_loop(0, t_chunk, step, x0)
    out_ref[...] = x_fin                # single unmasked full-tile store

    # Last chunk: final clip to [-1, 1] (matches torch.clip in forward()).
    @pl.when(c == n_chunks - 1)
    def _():
        out_ref[...] = jnp.clip(out_ref[...], -1.0, 1.0)


def _pick_hw_tile(hw):
    """Lane-dense tile (multiple of 128).  Split into >=2 tiles when possible
    so the 'parallel' grid axis can feed both v7x TensorCores; cap the tile so
    the loop-carried state stays compact."""
    if hw % 128 != 0 or hw < 256:
        return hw                       # full-extent block (always legal)
    cap = max(128, min(2048, (hw // 2) // 128 * 128))
    for cand in range(cap, 127, -128):
        if hw % cand == 0:
            return cand
    return hw


def _pick_t_chunk(n_steps, bc, hw_tile):
    """Largest divisor of T such that one noise chunk stays <= ~4 MiB in VMEM
    (double-buffered by the pipeline) and the folded-bias table stays small."""
    budget = 4 * 1024 * 1024
    max_chunk = max(1, min(n_steps, 512, budget // max(1, bc * hw_tile * 4)))
    for cand in range(max_chunk, 0, -1):
        if n_steps % cand == 0:
            return cand
    return 1


def _run_sampler(coef, dcol, w_bd, x2d, noise):
    bc, hw = x2d.shape
    n_steps = noise.shape[0]
    hw_tile = _pick_hw_tile(hw)
    n_hw = hw // hw_tile
    t_chunk = _pick_t_chunk(n_steps, bc, hw_tile)
    n_chunks = n_steps // t_chunk

    return pl.pallas_call(
        _sampler_kernel,
        out_shape=jax.ShapeDtypeStruct((bc, hw), jnp.float32),
        grid=(n_hw, n_chunks),
        in_specs=[
            # Per-step scalars, long axis last -> tiny SMEM footprint.
            pl.BlockSpec(memory_space=pltpu.MemorySpace.SMEM),            # coef (2, T)
            pl.BlockSpec((t_chunk, bc, 1), lambda h, c: (c, 0, 0)),       # d_t columns
            pl.BlockSpec((bc, bc), lambda h, c: (0, 0)),                  # W block-diag
            pl.BlockSpec((bc, hw_tile), lambda h, c: (0, h)),             # x_T tile
            pl.BlockSpec((t_chunk, bc, hw_tile), lambda h, c: (c, 0, h)), # noise chunk
        ],
        out_specs=pl.BlockSpec((bc, hw_tile), lambda h, c: (0, h)),
        compiler_params=pltpu.CompilerParams(
            dimension_semantics=("parallel", "arbitrary"),
            vmem_limit_bytes=32 * 1024 * 1024),
    )(coef, dcol, w_bd, x2d, noise)


# ----------------------------------------------------------------------------
# Host-side sampler (mirrors GaussianDiffusionSampler.__init__ / forward).
# ----------------------------------------------------------------------------
class GaussianDiffusionSamplerPallas:
    def __init__(self, beta_1, beta_T, T, num_class, channels,
                 var_type="fixedlarge", t_cutoff=100, n_intervals=5):
        assert var_type in ["fixedlarge", "fixedsmall"]
        self.T = T
        self.num_class = num_class
        self.t_cutoff = t_cutoff
        self.n_intervals = n_intervals
        self.split_points = np.linspace(0, t_cutoff, n_intervals + 1).astype(
            np.int64)

        betas = np.linspace(beta_1, beta_T, T, dtype=np.float64)
        alphas = 1.0 - betas
        alphas_bar = np.cumprod(alphas)
        alphas_bar_prev = np.concatenate([[1.0], alphas_bar])[:T]

        self.sqrt_recip_alphas_bar = np.sqrt(1.0 / alphas_bar)
        self.sqrt_recipm1_alphas_bar = np.sqrt(1.0 / alphas_bar - 1.0)
        posterior_var = betas * (1.0 - alphas_bar_prev) / (1.0 - alphas_bar)
        self.posterior_log_var_clipped = np.log(
            np.concatenate([posterior_var[1:2], posterior_var[1:]]))
        self.posterior_mean_coef1 = (np.sqrt(alphas_bar_prev) * betas /
                                     (1.0 - alphas_bar))
        self.posterior_mean_coef2 = (np.sqrt(alphas) *
                                     (1.0 - alphas_bar_prev) /
                                     (1.0 - alphas_bar))
        if var_type == "fixedlarge":
            self.model_log_var = np.log(
                np.concatenate([posterior_var[1:2], betas[1:]]))
        else:
            self.model_log_var = self.posterior_log_var_clipped

        # Deterministic synthetic eps-model parameters (stand-in for the UNet).
        kw, kt, ky = jax.random.split(jax.random.PRNGKey(0), 3)
        self.w = 0.05 * jax.random.normal(kw, (channels, channels),
                                          dtype=jnp.float32)
        self.temb_table = 0.1 * jax.random.normal(kt, (T, channels),
                                                  dtype=jnp.float32)
        self.yemb_table = 0.1 * jax.random.normal(ky, (num_class, channels),
                                                  dtype=jnp.float32)

    def _get_shared_timestep_scalar(self, t):
        if t < self.t_cutoff:
            idx = int(np.searchsorted(self.split_points, t, side="right")) - 1
            idx = max(0, min(idx, len(self.split_points) - 2))
            return int(self.split_points[idx])
        return int(t)

    def forward(self, x_T_nchw, omega=0.0, method="cfg",
                key=jax.random.PRNGKey(1)):
        B, C, H, W = x_T_nchw.shape
        HW = H * W
        BC = B * C
        # NCHW -> (B*C, H*W): lane-dense (pixels on lanes), pure reshape.
        x2d = jnp.reshape(x_T_nchw.astype(jnp.float32), (BC, HW))

        if method == "uncond":
            y = None
        else:
            key, ky = jax.random.split(key)
            y = jax.random.randint(ky, (B,), 0, self.num_class)

        cfg = float(omega) if (omega > 0 and method == "cfg") else 0.0

        # Host-side precompute (once, not per step): fused per-step scalars and
        # folded eps-model bias  bias_eff = temb[t_cut] + (1+omega)*yemb[y].
        temb_np = np.asarray(self.temb_table, dtype=np.float64)
        yemb_np = np.asarray(self.yemb_table, dtype=np.float64)
        y_np = None if y is None else np.asarray(y)

        a_tab = np.empty(self.T, dtype=np.float64)
        b_tab = np.empty(self.T, dtype=np.float64)
        s_tab = np.empty(self.T, dtype=np.float64)
        bias_np = np.empty((self.T, BC), dtype=np.float64)
        for r in range(self.T):
            t_step = self.T - 1 - r                     # reversed time order
            sra = self.sqrt_recip_alphas_bar[t_step]
            srm1 = self.sqrt_recipm1_alphas_bar[t_step]
            c1 = self.posterior_mean_coef1[t_step]
            c2 = self.posterior_mean_coef2[t_step]
            logv = self.model_log_var[t_step]
            a_tab[r] = c1 * sra + c2
            b_tab[r] = c1 * srm1
            s_tab[r] = np.exp(0.5 * logv) * (1.0 if t_step > 0 else 0.0)

            t_cut = self._get_shared_timestep_scalar(t_step)
            te = temb_np[t_cut]                         # (C,)
            if y_np is not None:
                bias_bc = te[None, :] + (1.0 + cfg) * yemb_np[y_np]   # (B, C)
            else:
                bias_bc = np.broadcast_to(te[None, :], (B, C))
            bias_np[r] = np.asarray(bias_bc).reshape(-1)

        coef = jnp.asarray(np.stack([a_tab, b_tab], axis=0),
                           dtype=jnp.float32)                         # (2, T)
        dcol = jnp.asarray(
            (-b_tab[:, None] * bias_np).reshape(self.T, BC, 1),
            dtype=jnp.float32)                                        # (T, BC, 1)

        # Host-generated standard normal noise, pre-scaled by sigma_t (exactly
        # zero on the final reverse step since sigma_0 = 0).
        key, kn = jax.random.split(key)
        noise = jax.random.normal(kn, (self.T, BC, HW), dtype=jnp.float32)
        noise = noise * jnp.asarray(s_tab, dtype=jnp.float32)[:, None, None]

        # Block-diagonal (BC, BC) channel-mixing weight: per pixel eps = x @ W.
        w_t = np.asarray(self.w, dtype=np.float32).T                  # (C_out, C_in)
        w_bd = np.zeros((BC, BC), dtype=np.float32)
        for b in range(B):
            w_bd[b * C:(b + 1) * C, b * C:(b + 1) * C] = w_t
        w_bd = jnp.asarray(w_bd)

        x_out = _run_sampler(coef, dcol, w_bd, x2d, noise)
        x_out = jnp.reshape(x_out, (B, C, H, W))        # back to NCHW
        return x_out, y


if __name__ == "__main__":
    B, C, H, W = 2, 4, 16, 16
    T = 8
    sampler = GaussianDiffusionSamplerPallas(
        beta_1=1e-4, beta_T=0.02, T=T, num_class=10, channels=C,
        var_type="fixedlarge", t_cutoff=4, n_intervals=2)

    key = jax.random.PRNGKey(0)
    x_T = jax.random.normal(key, (B, C, H, W), dtype=jnp.float32)

    x_0, y = sampler.forward(x_T, omega=0.0, method="cfg")
    x_0 = jax.block_until_ready(x_0)
    assert x_0.shape == (B, C, H, W)
    assert bool(jnp.all(jnp.isfinite(x_0)))
    assert float(jnp.max(jnp.abs(x_0))) <= 1.0 + 1e-6
    print("KERNEL_OK")
</pallas_src>

<mosaic_0001>
module attributes {stable_mosaic.version = 11 : i64} {
  func.func @_sampler_kernel(%arg0: i32, %arg1: i32, %arg2: memref<2x8xf32, #tpu.memory_space<smem>>, %arg3: memref<8x8x1xf32, #tpu.memory_space<vmem>>, %arg4: memref<8x8xf32, #tpu.memory_space<vmem>>, %arg5: memref<8x128xf32, #tpu.memory_space<vmem>>, %arg6: memref<8x8x128xf32, #tpu.memory_space<vmem>>, %arg7: memref<8x128xf32, #tpu.memory_space<vmem>>) attributes {dimension_semantics = [#tpu.dimension_semantics<parallel>, #tpu.dimension_semantics<arbitrary>], iteration_bounds = array<i64: 2, 1>, scalar_prefetch = 0 : i64, scratch_operands = 0 : i64, tpu.core_type = #tpu.core_type<tc>, window_params = [{transform_indices = @transform_0, window_bounds = array<i64: 2, 8>}, {transform_indices = @transform_1, window_bounds = array<i64: 8, 8, 1>}, {pipeline_mode = #tpu.pipeline_mode<synchronous>, transform_indices = @transform_2, window_bounds = array<i64: 8, 8>}, {transform_indices = @transform_3, window_bounds = array<i64: 8, 128>}, {transform_indices = @transform_4, window_bounds = array<i64: 8, 8, 128>}, {transform_indices = @transform_5, window_bounds = array<i64: 8, 128>}]} {
    %c0_i32 = arith.constant 0 : i32
    %0 = arith.cmpi eq, %arg1, %c0_i32 : i32
    %1 = arith.extui %0 : i1 to i32
    %c0_i32_0 = arith.constant 0 : i32
    %2 = arith.cmpi ne, %1, %c0_i32_0 : i32
    scf.if %2 {
      %c0_10 = arith.constant 0 : index
      %c0_11 = arith.constant 0 : index
      %11 = vector.load %arg5[%c0_10, %c0_11] : memref<8x128xf32, #tpu.memory_space<vmem>>, vector<8x128xf32>
      %c0_12 = arith.constant 0 : index
      %c0_13 = arith.constant 0 : index
      %12 = vector.load %arg7[%c0_12, %c0_13] : memref<8x128xf32, #tpu.memory_space<vmem>>, vector<8x128xf32>
      tpu.vector_store %arg7[%c0_12, %c0_13], %11 {strides = array<i32>} : memref<8x128xf32, #tpu.memory_space<vmem>>, vector<8x128xf32>,
    } else {
    }
    %c0 = arith.constant 0 : index
    %c0_1 = arith.constant 0 : index
    %3 = vector.load %arg4[%c0, %c0_1] : memref<8x8xf32, #tpu.memory_space<vmem>>, vector<8x8xf32>
    %c0_2 = arith.constant 0 : index
    %c0_3 = arith.constant 0 : index
    %4 = vector.load %arg7[%c0_2, %c0_3] : memref<8x128xf32, #tpu.memory_space<vmem>>, vector<8x128xf32>
    %c0_i32_4 = arith.constant 0 : i32
    %c8_i32 = arith.constant 8 : i32
    %5 = arith.addi %c0_i32_4, %c8_i32 : i32
    %c1_i32 = arith.constant 1 : i32
    %6 = scf.for %arg8 = %c0_i32_4 to %5 step %c1_i32 iter_args(%arg9 = %4) -> (vector<8x128xf32>)  : i32 {
      %c8_i32_10 = arith.constant 8 : i32
      %11 = arith.muli %arg1, %c8_i32_10 : i32
      %12 = arith.addi %11, %arg8 : i32
      %c0_11 = arith.constant 0 : index
      %13 = arith.index_cast %12 : i32 to index
      %14 = memref.load %arg2[%c0_11, %13] : memref<2x8xf32, #tpu.memory_space<smem>>
      %c1 = arith.constant 1 : index
      %15 = arith.index_cast %12 : i32 to index
      %16 = memref.load %arg2[%c1, %15] : memref<2x8xf32, #tpu.memory_space<smem>>
      %17 = arith.index_cast %arg8 : i32 to index
      %c0_12 = arith.constant 0 : index
      %c0_13 = arith.constant 0 : index
      %18 = vector.load %arg3[%17, %c0_12, %c0_13] : memref<8x8x1xf32, #tpu.memory_space<vmem>>, vector<1x8x1xf32>
      %19 = vector.shape_cast %18 : vector<1x8x1xf32> to vector<8x1xf32>
      %20 = arith.index_cast %arg8 : i32 to index
      %c0_14 = arith.constant 0 : index
      %c0_15 = arith.constant 0 : index
      %21 = vector.load %arg6[%20, %c0_14, %c0_15] : memref<8x8x128xf32, #tpu.memory_space<vmem>>, vector<1x8x128xf32>
      %22 = vector.shape_cast %21 : vector<1x8x128xf32> to vector<8x128xf32>
      %cst = arith.constant dense<0.000000e+00> : vector<8x128xf32>
      %23 = tpu.matmul %3, %arg9, %cst {dimension_numbers = #tpu.dot_dimension_numbers<[1], [0], [0], [1], [0, 0, 1, 1], [], []>} : vector<8x8xf32>, vector<8x128xf32>, vector<8x128xf32> -> vector<8x128xf32>
      %24 = vector.broadcast %14 : f32 to vector<8x128xf32>
      %25 = arith.mulf %24, %arg9 : vector<8x128xf32>
      %26 = vector.broadcast %16 : f32 to vector<8x128xf32>
      %27 = arith.mulf %26, %23 : vector<8x128xf32>
      %28 = arith.subf %25, %27 : vector<8x128xf32>
      %29 = vector.broadcast %19 : vector<8x1xf32> to vector<8x128xf32>
      %30 = arith.addf %28, %29 : vector<8x128xf32>
      %31 = arith.addf %30, %22 : vector<8x128xf32>
      scf.yield %31 : vector<8x128xf32>
    }
    %c8_i32_5 = arith.constant 8 : i32
    %c0_6 = arith.constant 0 : index
    %c0_7 = arith.constant 0 : index
    %7 = vector.load %arg7[%c0_6, %c0_7] : memref<8x128xf32, #tpu.memory_space<vmem>>, vector<8x128xf32>
    tpu.vector_store %arg7[%c0_6, %c0_7], %6 {strides = array<i32>} : memref<8x128xf32, #tpu.memory_space<vmem>>, vector<8x128xf32>,
    %c0_i32_8 = arith.constant 0 : i32
    %8 = arith.cmpi eq, %arg1, %c0_i32_8 : i32
    %9 = arith.extui %8 : i1 to i32
    %c0_i32_9 = arith.constant 0 : i32
    %10 = arith.cmpi ne, %9, %c0_i32_9 : i32
    scf.if %10 {
      %c0_10 = arith.constant 0 : index
      %c0_11 = arith.constant 0 : index
      %11 = vector.load %arg7[%c0_10, %c0_11] : memref<8x128xf32, #tpu.memory_space<vmem>>, vector<8x128xf32>
      %cst = arith.constant -1.000000e+00 : f32
      %cst_12 = arith.constant 1.000000e+00 : f32
      %12 = vector.broadcast %cst : f32 to vector<8x128xf32>
      %13 = arith.maximumf %12, %11 : vector<8x128xf32>
      %14 = vector.broadcast %cst_12 : f32 to vector<8x128xf32>
      %15 = arith.minimumf %14, %13 : vector<8x128xf32>
      %c0_13 = arith.constant 0 : index
      %c0_14 = arith.constant 0 : index
      %16 = vector.load %arg7[%c0_13, %c0_14] : memref<8x128xf32, #tpu.memory_space<vmem>>, vector<8x128xf32>
      tpu.vector_store %arg7[%c0_13, %c0_14], %15 {strides = array<i32>} : memref<8x128xf32, #tpu.memory_space<vmem>>, vector<8x128xf32>,
    } else {
    }
    return
  }
  func.func @transform_0(%arg0: i32, %arg1: i32) -> (i32, i32) {
    %c0_i32 = arith.constant 0 : i32
    %c0_i32_0 = arith.constant 0 : i32
    %c0_i32_1 = arith.constant 0 : i32
    return %c0_i32, %c0_i32_0 : i32, i32
  }
  func.func @transform_1(%arg0: i32, %arg1: i32) -> (i32, i32, i32) {
    %c0_i32 = arith.constant 0 : i32
    %c0_i32_0 = arith.constant 0 : i32
    %c0_i32_1 = arith.constant 0 : i32
    return %arg1, %c0_i32, %c0_i32_0 : i32, i32, i32
  }
  func.func @transform_2(%arg0: i32, %arg1: i32) -> (i32, i32) {
    %c0_i32 = arith.constant 0 : i32
    %c0_i32_0 = arith.constant 0 : i32
    %c0_i32_1 = arith.constant 0 : i32
    return %c0_i32, %c0_i32_0 : i32, i32
  }
  func.func @transform_3(%arg0: i32, %arg1: i32) -> (i32, i32) {
    %c0_i32 = arith.constant 0 : i32
    %c0_i32_0 = arith.constant 0 : i32
    return %c0_i32, %arg0 : i32, i32
  }
  func.func @transform_4(%arg0: i32, %arg1: i32) -> (i32, i32, i32) {
    %c0_i32 = arith.constant 0 : i32
    %c0_i32_0 = arith.constant 0 : i32
    return %arg1, %c0_i32, %arg0 : i32, i32, i32
  }
  func.func @transform_5(%arg0: i32, %arg1: i32) -> (i32, i32) {
    %c0_i32 = arith.constant 0 : i32
    %c0_i32_0 = arith.constant 0 : i32
    return %c0_i32, %arg0 : i32, i32
  }
}

</mosaic_0001>

<bundles_post_ra>
// kernel: tpu_custom_call.1
= control target key start
LH: loop header
LB: loop body
LE: loop exit
PB: predicated region body
PF: predicated region fallthrough
CT: control target
= control target key end

     0   :  { %s1021_s0 = inlined_call_operand.vmem [shape: f32[2,8], index: 0, kind: input, shape index: {}]   ;;  %s1022_s1 = inlined_call_operand.vmem [shape: f32[8,8,1], index: 1, kind: input, shape index: {}]   ;;  %s1023_s2 = inlined_call_operand.vmem [shape: f32[8,8], index: 2, kind: input, shape index: {}]   ;;  %s1024_s3 = inlined_call_operand.vmem [shape: f32[8,256], index: 3, kind: input, shape index: {}]   ;;  %s1025_s4 = inlined_call_operand.hbm [shape: f32[8,8,256], index: 4, kind: input, shape index: {}]   ;;  %s1026_s5 = inlined_call_operand.hbm [shape: f32[8,256], index: 5, kind: output, shape index: {}]  }
   0x1   :  { %1031 = sst [smem:[#allocation14_spill]] %s1021_s0 }
   0x2   :  { %10 = vsyncpa [#allocation5], 0 }
   0x3   :  { %11 = vsyncpa [#allocation3], 0 }
   0x4   :  { %13 = vsyncpa [#allocation3 + $0x1], 0 }
   0x5   :  { %14 = vsyncpa [#allocation4], 0 }
   0x6   :  { %16 = vsyncpa [#allocation4 + $0x1], 0  ;;  %s838_s18 = smov 0   ;;  %s840_s19 = smov 0  }
   0x7   :  { %s842_s20 = smov 0   ;;  %s844_s21 = smov 0  }
   0x8   :  { %s846_s22 = smov 0   ;;  %s848_s23 = smov 0  }
   0x9 LB: > { %1032 = sst [smem:[#allocation11_spill]] %s773_s18  ;;  %s537_s24 = sadd.s32 4294967295, %s793_s23   ;;  %s793_s23 = sphi %s848_s23, %s22_s23   ;;  %s789_s22 = sphi %s846_s22, %s1050_s22   ;;  %s785_s21 = sphi %s844_s21, %s1049_s21   ;;  %s781_s20 = sphi %s842_s20, %s1048_s20   ;;  %s777_s19 = sphi %s840_s19, %s1047_s19   ;;  %s773_s18 = sphi %s838_s18, %s1046_s18  }
   0xa   : > { %1033 = sst [smem:[#allocation12_spill]] %s793_s23  ;;  %s538_s25 = sadd.s32 4294967294, %s793_s23  }
   0xb   : > { %s137_s26 = sadd.s32 1, %s781_s20  ;;  %p144_p0 = scmp.ne.s32.totalorder %s781_s20, %s777_s19 }
   0xc   : > { %p145_p1 = scmp.eq.s32.totalorder %s793_s23, 0  ;;  %p150_p2 = scmp.ne.s32.totalorder %s777_s19, %s773_s18 }
   0xd   : > { %p876_p3 = scmp.eq.s32.totalorder %s537_s24, 0  ;;  %p174_p4 = scmp.eq.s32.totalorder %s537_s24, 1 }
   0xe   : > { %p880_p5 = por %p145_p1, %p144_p0  ;;  %p180_p6 = scmp.eq.s32.totalorder %s538_s25, 1 }
   0xf   : > { %p886_p7 = por %p876_p3, %p150_p2  ;;  %p890_p8 = por %p174_p4, %p144_p0 }
  0x10   : > { %p894_p9 = por %p180_p6, %p150_p2  ;;  %p539_p10 = scmp.ge.s32.totalorder %s793_s23, 1 }
  0x11   : > { %p187_p11 = scmp.lt.s32.totalorder %s793_s23, 3  ;;  %s1040_s0 = sld [smem:[#allocation14_spill]] }
  0x12   : > { %s1038_s6 = scalar_select %p894_p9, 1, 0 }
  0x13   : > { %p903_p12 = pnand %p539_p10, %p187_p11  ;;  %p542_p13 = scmp.ge.s32.totalorder %s793_s23, 2 }
  0x14   : > { %1039 = sst [smem:[#allocation13_spill]] %s1038_s6  ;;  %p581_p0 = scmp.lt.s32.totalorder %s793_s23, 2 }
  0x15   : > { %p568_p1 = pneg %p903_p12  ;;  %s34_s12 = sadd.s32 1, %s789_s22 }
  0x16   : > { %p913_p2 = pnand %p581_p0, %p880_p5  ;;  %p36_p6 = scmp.ge.s32.totalorder %s34_s12, 2 }
  0x17   : > { %s199_s9 = sshll.u32 %s1040_s0, 4  ;;  %p569_p4 = pnand %p568_p1, %p876_p3  ;;  %s200_s9 = int_to_ptr.vmem [resolvable:$true] %s199_s9 }
  0x18   : > { %s229_s13 = sand.u32 1, %s781_s20   ;;  %s803_s14 = smov [#allocation2]  }
  0x19   : > { %571 = dma.vmem_to_smem (!%p569_p4), %s200_s9, 32, %s803_s14, [#allocation5]  }
  0x1a   : > { %s1052_s12 = smov (%p36_p6, %s34_s12), 0  ;;  %s543_s15 = sshll.u32 %s229_s13, 6 }
  0x1b   : > { %s133_s16 = ssub.s32 %s789_s22, %s1052_s12  ;;  %s544_s17 = sshll.u32 %s789_s22, 3 }
  0x1c   : > { %p135_p10 = scmp.eq.s32.totalorder %s133_s16, 0  ;;  %s240_s28 = scalar_lea.hbm %s1025_s4, %s544_s17 }
  0x1d   : > { %s233_s7 = scalar_lea.vmem [#allocation6], %s543_s15  ;;  %s241_s23 = sshll.u32 %s240_s28, 4  ;;  %s242_s23 = int_to_ptr.hbm [resolvable:$true] %s241_s23 }
  0x1e   : > { %s243_s8 = sshll.u32 %s233_s7, 4  ;;  %s230_s9 = scalar_lea.sflag [#allocation3], %s229_s13  ;;  %s244_s8 = int_to_ptr.vmem [resolvable:$true] %s243_s8 }
  0x1f   : > { %s932_s0 = scalar_select %p135_p10, %s781_s20, %s137_s26  }
  0x20   : > { %s804_s14 = smov 256   ;;  %s805_s6 = smov 128  }
  0x21   : > { %s806_s18 = smov 8   ;;  %255 = sbr.rel (%p903_p12) target bundleno = 193 (0xc1), region = 40 }
  0x22   : > { %575 = dma.hbm_to_vmem [thread:$0]  (!%p913_p2), %s242_s23, 1024, %s244_s8, %s230_s9, %s804_s14, %s805_s6, %s806_s18  }
  0x26   : > { %760 = dma.done.wait (%p876_p3), [#allocation5], 32  }
  0x27   : > { %762 = vsyncadd (%p876_p3), [#allocation5], 4294967264  ;;  %s943_s26 = sand.u32 1, %s777_s19  }
  0x28   : > { %s547_s13 = sshll.u32 %s943_s26, 6  ;;  %s263_s15 = scalar_lea.sflag [#allocation3], %s943_s26 }
  0x29   : > { %s947_s16 = scalar_lea.vmem [#allocation6], %s547_s13 }
  0x2a   : > { %764 = dma.done.wait (%p886_p7), %s263_s15, 1024  }
  0x2b   : > { %766 = vsyncadd (%p886_p7), %s263_s15, 4294966272 }
  0x2c   : > { %272 = sfence }
  0x2d   : > { %p310_p3 = scmp.lt.s32.totalorder %s785_s21, 1  ;;  %v321_v0 = vld [vmem:[%s1023_s2] sm:$0xff]  ;;  %s548_s27 = sshll.u32 %s943_s26, 3 }
  0x2e   : > { %s962_s25 = scalar_lea.vmem [#allocation7], %s548_s27  ;;  %s965_s29 = smov 0  }
  0x2f   : > { %s311_s6 = scalar_select %p310_p3, %s785_s21, 1 }
  0x31   : > { %s549_s10 = sshll.u32 %s311_s6, 3 }
  0x32   : > { %s313_s24 = scalar_lea.vmem %s1024_s3, %s549_s10 }
  0x33   : > { %v319_v1 = vld [vmem:[%s313_s24] sm:$0xff]  }
  0x34   : > { %320 = vst [vmem:[%s962_s25] sm:$0xff] %v319_v1  ;;  %v795_v2 = vmov %v319_v1  }
  0x35 LB: >> { %vm346_vm0 = vcmask 64512   ;;  %v807_v3 = vmov 0   ;;  %s332_s28 = sld [smem:[#allocation2 + %s801_s29]]  ;;  %365 = vmatpush.msra.mxu0 %v797_v2  ;;  %s551_s7 = sshll.u32 %s801_s29, 3  ;;  %s801_s29 = sphi %s965_s29, %s328_s29   ;;  %v797_v2 = vphi %v795_v2, %v796_v2  }
  0x36   : >> { %653 = vset.pattern.permute.xlu0 %v807_v3  ;;  %552 = vmatmul.msk.f32.vlgmr.msra.gmra.mxu0 %vm346_vm0, %v321_v0  ;;  %s342_s14 = scalar_lea.vmem %s1022_s1, %s551_s7  ;;  %s333_s13 = sshra.s32 %s801_s29, 7 }
  0x37   : >> { %v343_v4 = vld [vmem:[%s342_s14] sm:$0xff]  ;;  %s558_s15 = sshll.u32 %s333_s13, 7  ;;  %s338_s23 = sand.u32 127, %s801_s29 }
  0x38   : >> { %377 = vperm.xlu0 %653, %v343_v4   ;;  %s559_s18 = sadd.s32 128, %s558_s15  ;;  %s344_s10 = scalar_lea.vmem %s947_s16, %s551_s7 [#allocation6] }
  0x39   : >> { %s339_s27 = sadd.s32 %s559_s18, %s338_s23  ;;  %v345_v12 = vld [vmem:[%s344_s10] sm:$0xff]  ;;  %s328_s29 = sadd.s32 1, %s801_s29  }
  0x3a   : >> { %s340_s6 = sld [smem:[#allocation2 + %s339_s27]]  ;;  %p325_p5 = scmp.ge.s32.totalorder %s328_s29, 8  }
  0x3b   : >> { %v370_v5 = vstv %s332_s28  ;;  %s555_s11 = sshll.u32 (%p325_p5), %s785_s21, 3  ;;  %s403_s7 = sshll.u32 (%p325_p5), %s962_s25, 4  ;;  %s404_s7 = int_to_ptr.vmem [resolvable:$true] %s403_s7 }
  0x3c   : >> { %v371_v6 = vmul.f32 %v797_v2, %v370_v5  ;;  %s401_s28 = scalar_lea.hbm (%p325_p5), %s1026_s5, %s555_s11  ;;  %s391_s9 = scalar_lea.sflag (%p325_p5), [#allocation4], %s943_s26 }
  0x3d   : > { %s405_s8 = sshll.u32 (%p325_p5), %s401_s28, 4  ;;  %s719_s21 = scalar_lea.hbm (%p325_p5), %s1026_s5, 16  ;;  %s406_s8 = int_to_ptr.hbm [resolvable:$true] %s405_s8 }
  0x3e   : > { %s713_s14 = sshra.s32 (%p325_p5), %s406_s8, 4  ;;  %s714_s14 = int_to_ptr.hbm [resolvable:$true] %s713_s14 }
  0x3f   : > { %s715_s29 = scalar_lea.hbm (%p325_p5), %s714_s14, 8  ;;  %p720_p0 = scmp.lt.s32.totalorder (%p325_p5), %s714_s14, %s1026_s5 }
  0x40   : >> { %v372_v7 = vstv %s340_s6  ;;  %p716_p7 = scmp.ne.s32.totalorder (%p325_p5), %s714_s14, %s715_s29  ;;  %p721_p1 = scmp.lt.s32.totalorder (%p325_p5), %s719_s21, %s715_s29 }
  0x42   : > { %p717_p11 = pnand (%p325_p5), %p716_p7, %p890_p8  ;;  %p722_p2 = por (%p325_p5), %p721_p1, %p720_p0 }
  0x44   : > { %p718_p12 = pneg (%p325_p5), %p717_p11 }
  0x46   : > { %p723_p4 = pnand (%p325_p5), %p722_p2, %p718_p12 }
  0xaa   : >> { %v378_v10 = vpop.permute.xlu0 %377 }
  0xb3   : >> { %v367_v8 = vpop.f32.mrf.mxu0 }
  0xb4   : >> { %v373_v9 = vmul.f32 %v372_v7, %v367_v8 }
  0xb6   : >> { %v374_v11 = vsub.f32 %v371_v6, %v373_v9 }
  0xb8   : >> { %v380_v13 = vadd.f32 %v378_v10, %v374_v11  ;;  %327 = sbr.rel (!%p325_p5) target bundleno = 53 (0x35), region = 113 }
  0xba   : >> { %v381_v14 = vadd.f32 %v380_v13, %v345_v12  }
  0xbc   : >> { %v796_v2 = vmov %v381_v14   ;;  %v553_v15 = vclamps-f32 (%p325_p5), %v381_v14, 1.0 }
  0xbe   : > { %389 = vst [vmem:[%s962_s25] sm:$0xff] %v553_v15 }
  0xbf   : > { %726 = shalt.err (!%p723_p4)
}
  0xc0   : > { %566 = dma.vmem_to_hbm [thread:$0]  (%p890_p8), %s404_s7, 128, %s406_s8, %s391_s9  }
  0xc1 PF: > { %s1043_s26 = sld [smem:[#allocation11_spill]]  ;;  %p577_p6 = pnand %p542_p13, %p894_p9 }
  0xc2   : > { %s1045_s23 = sld [smem:[#allocation12_spill]] }
  0xc3   : > { %p578_p10 = pneg %p577_p6 }
  0xc7   : > { %s417_s27 = sand.u32 1, %s1043_s26  }
  0xc8   : > { %s418_s6 = scalar_lea.sflag [#allocation4], %s417_s27 }
  0xc9   : > { %768 = dma.done.wait (%p578_p10), %s418_s6, 128  }
  0xca   : > { %770 = vsyncadd (%p578_p10), %s418_s6, 4294967168  ;;  %s22_s23 = sadd.s32 1, %s1045_s23   ;;  %s1046_s18 = smov %s777_s19 }
  0xcb   : > { %p19_p3 = scmp.ge.s32.totalorder %s22_s23, 4   ;;  %s1047_s19 = smov %s781_s20 }
  0xcc   : > { %s1048_s20 = smov %s932_s0  ;;  %s1049_s21 = smov %s789_s22 }
  0xcd   : > { %s1050_s22 = smov %s1052_s12  ;;  %21 = sbr.rel (!%p19_p3) target bundleno = 9 (0x9), region = 124 }
  0xd2   :  { %424 = vsyncpa [#allocation3], 1 }
  0xd3   :  { %426 = vsyncpa [#allocation3 + $0x1], 1 }
  0xd4   :  { %427 = vsyncpa [#allocation4], 1 }
  0xd5   :  { %429 = vsyncpa [#allocation4 + $0x1], 1 }
  0xd6   :  { %430 = vsyncpa [#allocation5], 1 }
  0xd7   :  { %432 = vsyncpa [#allocation5 + $0x1], 1 }

</bundles_post_ra>
